<compile_context>
chip_gen: v5e
topology: v5e:2x2
jax: 0.10.0
libtpu: 0.0.40
codegen_flags: <defaults>
</compile_context>

<pallas_src>
import jax
import jax.numpy as jnp
from jax.experimental import pallas as pl
from jax.experimental.pallas import tpu as pltpu

LAYERS = (64, 32, 16, 8)   # same default as the PyTorch module
EMB_DIM = LAYERS[0] // 2   # 32 per side
LANES = 128


def _mlp_kernel(u_ref, i_ref,
                w1_ref, b1_ref,
                w2_ref, b2_ref,
                w3_ref, b3_ref,
                wl_ref, bl_ref,
                o_ref,
                x_scratch):
    """Fused transposed MLP forward for one batch tile.

    Activations are (features, batch_tile): features on sublanes, batch on lanes.
    Matmul operands are bf16 (MXU-native on v6e/v7x), accumulation & elementwise f32.
    """
    # Fuse concat([u, i]): write both halves into one (64, T) bf16 scratch so layer 1
    # is a single K=64 dot (half the MXU pushes of two K=32 dots).
    x_scratch[0:EMB_DIM, :] = u_ref[...]
    x_scratch[EMB_DIM:, :] = i_ref[...]

    # Layer 1 (64 -> 32)
    h = jnp.dot(w1_ref[...], x_scratch[...], preferred_element_type=jnp.float32)
    h = jnp.maximum(h + b1_ref[...], 0.0)                                   # (32, T) f32

    # Layer 2 (32 -> 16)
    h = jnp.dot(w2_ref[...], h.astype(jnp.bfloat16),
                preferred_element_type=jnp.float32) + b2_ref[...]
    h = jnp.maximum(h, 0.0)                                                 # (16, T) f32

    # Layer 3 (16 -> 8)
    h = jnp.dot(w3_ref[...], h.astype(jnp.bfloat16),
                preferred_element_type=jnp.float32) + b3_ref[...]
    h = jnp.maximum(h, 0.0)                                                 # (8, T) f32

    # Logit layer (8 -> 1) on the VPU (mul) + XLU (sublane reduce): avoids a degenerate
    # N=1 MXU matmul and yields the lane-dense (1, T) result directly.
    logit = jnp.sum(h * wl_ref[...], axis=0, keepdims=True) + bl_ref[...]   # (1, T)
    o_ref[...] = jax.nn.sigmoid(logit).astype(o_ref.dtype)


def _choose_tile(batch, requested):
    """Lane-aligned batch tile; keeps num_tiles >= 2 whenever possible (v7x megacore)."""
    assert requested % LANES == 0, "batch_tile must be a multiple of 128"
    lane_groups = -(-batch // LANES)                  # batch size in 128-lane units
    tile_groups = min(requested // LANES, lane_groups)
    if lane_groups >= 2:                              # both v7x TensorCores get work
        tile_groups = min(tile_groups, (lane_groups + 1) // 2)
    tile = max(tile_groups, 1) * LANES
    num_tiles = -(-batch // tile)
    return tile, num_tiles


def mlp_forward(params, users, items, *, batch_tile=2048):
    """Full MLP.forward: embedding gather (XLA glue) + fused Pallas MLP kernel."""
    B = users.shape[0]
    tile, num_tiles = _choose_tile(B, batch_tile)
    B_pad = num_tiles * tile

    # Pad the cheap int32 indices, never the gathered f32/bf16 activations.
    if B_pad != B:
        users = jnp.pad(users, (0, B_pad - B))
        items = jnp.pad(items, (0, B_pad - B))

    # --- glue: embedding gather, already in the (emb, B) layout the kernel consumes.
    # The bf16 cast fuses into the gather, so the hot stream hits HBM once, in bf16.
    u_t = jnp.take(params["user_emb_t"], users, axis=1).astype(jnp.bfloat16)  # (32, B_pad)
    i_t = jnp.take(params["item_emb_t"], items, axis=1).astype(jnp.bfloat16)  # (32, B_pad)

    # Weights stay in PyTorch (out, in) layout; matmul weights streamed as bf16,
    # biases / logit weight stay f32 (they only feed f32 VPU math).
    w1 = params["w1"].astype(jnp.bfloat16)    # (32, 64)
    w2 = params["w2"].astype(jnp.bfloat16)    # (16, 32)
    w3 = params["w3"].astype(jnp.bfloat16)    # (8, 16)
    b1 = params["b1"].reshape(-1, 1)          # (32, 1)
    b2 = params["b2"].reshape(-1, 1)          # (16, 1)
    b3 = params["b3"].reshape(-1, 1)          # (8, 1)
    wl = params["wl"].reshape(-1, 1)          # (8, 1)
    bl = params["bl"].reshape(1, 1)           # (1, 1)

    def full(arr):
        return pl.BlockSpec(arr.shape, lambda i: (0, 0))

    # Advisory cost so XLA can overlap this call with the surrounding gather ops.
    flops = 2 * B_pad * (32 * 64 + 16 * 32 + 8 * 16 + 8)
    weight_bytes = sum(int(a.size) * a.dtype.itemsize
                       for a in (w1, b1, w2, b2, w3, b3, wl, bl))
    bytes_accessed = B_pad * (2 * EMB_DIM * 2 + 4) + weight_bytes
    cost = pl.CostEstimate(flops=flops, transcendentals=B_pad,
                           bytes_accessed=bytes_accessed)

    out = pl.pallas_call(
        _mlp_kernel,
        out_shape=jax.ShapeDtypeStruct((1, B_pad), jnp.float32),
        grid_spec=pltpu.PrefetchScalarGridSpec(
            num_scalar_prefetch=0,
            grid=(num_tiles,),
            in_specs=[
                pl.BlockSpec((EMB_DIM, tile), lambda i: (0, i)),   # u_t tile
                pl.BlockSpec((EMB_DIM, tile), lambda i: (0, i)),   # i_t tile
                full(w1), full(b1),
                full(w2), full(b2),
                full(w3), full(b3),
                full(wl), full(bl),
            ],
            out_specs=pl.BlockSpec((1, tile), lambda i: (0, i)),   # lane-dense output
            scratch_shapes=[pltpu.VMEM((LAYERS[0], tile), jnp.bfloat16)],
        ),
        compiler_params=pltpu.CompilerParams(
            dimension_semantics=("parallel",)),
        cost_estimate=cost,
    )(u_t, i_t, w1, b1, w2, b2, w3, b3, wl, bl)

    return out.reshape(-1)[:B]   # drop tail padding; matches .view(-1)


def init_params(key, num_users, num_items, layers=LAYERS):
    """Deterministic init mirroring MLP._init_weight() (PyTorch layouts)."""
    ks = jax.random.split(key, 16)
    k_iter = iter(ks)

    def xavier_uniform(k, fan_out, fan_in):
        bound = jnp.sqrt(6.0 / (fan_in + fan_out))
        # PyTorch Linear weight layout: (out_features, in_features)
        return jax.random.uniform(k, (fan_out, fan_in), jnp.float32, -bound, bound)

    def linear_bias(k, fan_in, fan_out):
        # PyTorch nn.Linear default bias init: U(-1/sqrt(fan_in), 1/sqrt(fan_in))
        bound = 1.0 / jnp.sqrt(jnp.float32(fan_in))
        return jax.random.uniform(k, (fan_out,), jnp.float32, -bound, bound)

    emb = layers[0] // 2
    params = {
        # Tables stored transposed (emb, num) so the XLA gather yields the (emb, B)
        # layout the kernel wants without an extra transpose copy over the hot data.
        "user_emb_t": 0.01 * jax.random.normal(next(k_iter), (emb, num_users), jnp.float32),
        "item_emb_t": 0.01 * jax.random.normal(next(k_iter), (emb, num_items), jnp.float32),
    }
    dims = list(zip(layers[:-1], layers[1:]))  # (64,32), (32,16), (16,8)
    for n, (fi, fo) in enumerate(dims, start=1):
        params[f"w{n}"] = xavier_uniform(next(k_iter), fo, fi)
        params[f"b{n}"] = linear_bias(next(k_iter), fi, fo)
    params["wl"] = 0.01 * jax.random.normal(next(k_iter), (1, layers[-1]), jnp.float32)
    params["bl"] = linear_bias(next(k_iter), layers[-1], 1)
    return params


def mlp_reference(params, users, items):
    """Pure-JAX f32 reference of the same forward pass (PyTorch semantics)."""
    u = params["user_emb_t"][:, users].T       # (B, 32)
    i = params["item_emb_t"][:, items].T       # (B, 32)
    h = jnp.concatenate([u, i], axis=-1)       # (B, 64)
    for n in (1, 2, 3):
        h = jnp.maximum(h @ params[f"w{n}"].T + params[f"b{n}"], 0.0)
    return jax.nn.sigmoid(h @ params["wl"].T + params["bl"]).reshape(-1)


if __name__ == "__main__":
    num_users, num_items = 50, 40
    batch = 1000   # not lane/tile aligned -> exercises index padding + a 2-step grid

    key = jax.random.PRNGKey(0)
    k_params, k_u, k_i = jax.random.split(key, 3)

    params = init_params(k_params, num_users, num_items)
    users = jax.random.randint(k_u, (batch,), 0, num_users, dtype=jnp.int32)
    items = jax.random.randint(k_i, (batch,), 0, num_items, dtype=jnp.int32)

    out = jax.block_until_ready(mlp_forward(params, users, items))
    ref = jax.block_until_ready(mlp_reference(params, users, items))

    assert out.shape == (batch,)
    # bf16 streaming of activations/weights -> loosened tolerance vs the f32 reference.
    assert jnp.allclose(out, ref, atol=2e-2, rtol=2e-2), (out, ref)
    print("KERNEL_OK")
</pallas_src>

<mosaic_0001>
module attributes {stable_mosaic.version = 11 : i64} {
  func.func @_mlp_kernel(%arg0: i32, %arg1: memref<32x512xbf16, #tpu.memory_space<vmem>>, %arg2: memref<32x512xbf16, #tpu.memory_space<vmem>>, %arg3: memref<32x64xbf16, #tpu.memory_space<vmem>>, %arg4: memref<32x1xf32, #tpu.memory_space<vmem>>, %arg5: memref<16x32xbf16, #tpu.memory_space<vmem>>, %arg6: memref<16x1xf32, #tpu.memory_space<vmem>>, %arg7: memref<8x16xbf16, #tpu.memory_space<vmem>>, %arg8: memref<8x1xf32, #tpu.memory_space<vmem>>, %arg9: memref<8x1xf32, #tpu.memory_space<vmem>>, %arg10: memref<1x1xf32, #tpu.memory_space<vmem>>, %arg11: memref<1x512xf32, #tpu.memory_space<vmem>>, %arg12: memref<64x512xbf16, #tpu.memory_space<vmem>>) attributes {dimension_semantics = [#tpu.dimension_semantics<parallel>], iteration_bounds = array<i64: 2>, scalar_prefetch = 0 : i64, scratch_operands = 1 : i64, tpu.core_type = #tpu.core_type<tc>, window_params = [{transform_indices = @transform_0, window_bounds = array<i64: 32, 512>}, {transform_indices = @transform_1, window_bounds = array<i64: 32, 512>}, {pipeline_mode = #tpu.pipeline_mode<synchronous>, transform_indices = @transform_2, window_bounds = array<i64: 32, 64>}, {pipeline_mode = #tpu.pipeline_mode<synchronous>, transform_indices = @transform_3, window_bounds = array<i64: 32, 1>}, {pipeline_mode = #tpu.pipeline_mode<synchronous>, transform_indices = @transform_4, window_bounds = array<i64: 16, 32>}, {pipeline_mode = #tpu.pipeline_mode<synchronous>, transform_indices = @transform_5, window_bounds = array<i64: 16, 1>}, {pipeline_mode = #tpu.pipeline_mode<synchronous>, transform_indices = @transform_6, window_bounds = array<i64: 8, 16>}, {pipeline_mode = #tpu.pipeline_mode<synchronous>, transform_indices = @transform_7, window_bounds = array<i64: 8, 1>}, {pipeline_mode = #tpu.pipeline_mode<synchronous>, transform_indices = @transform_8, window_bounds = array<i64: 8, 1>}, {pipeline_mode = #tpu.pipeline_mode<synchronous>, transform_indices = @transform_9, window_bounds = array<i64: 1, 1>}, {transform_indices = @transform_10, window_bounds = array<i64: 1, 512>}]} {
    %c0 = arith.constant 0 : index
    %c0_0 = arith.constant 0 : index
    %0 = vector.load %arg1[%c0, %c0_0] : memref<32x512xbf16, #tpu.memory_space<vmem>>, vector<32x512xbf16>
    %c0_1 = arith.constant 0 : index
    %c0_2 = arith.constant 0 : index
    %1 = vector.load %arg12[%c0_1, %c0_2] : memref<64x512xbf16, #tpu.memory_space<vmem>>, vector<32x512xbf16>
    tpu.vector_store %arg12[%c0_1, %c0_2], %0 {strides = array<i32>} : memref<64x512xbf16, #tpu.memory_space<vmem>>, vector<32x512xbf16>,
    %c0_3 = arith.constant 0 : index
    %c0_4 = arith.constant 0 : index
    %2 = vector.load %arg2[%c0_3, %c0_4] : memref<32x512xbf16, #tpu.memory_space<vmem>>, vector<32x512xbf16>
    %c32 = arith.constant 32 : index
    %c0_5 = arith.constant 0 : index
    %3 = vector.load %arg12[%c32, %c0_5] : memref<64x512xbf16, #tpu.memory_space<vmem>>, vector<32x512xbf16>
    tpu.vector_store %arg12[%c32, %c0_5], %2 {strides = array<i32>} : memref<64x512xbf16, #tpu.memory_space<vmem>>, vector<32x512xbf16>,
    %c0_6 = arith.constant 0 : index
    %c0_7 = arith.constant 0 : index
    %4 = vector.load %arg3[%c0_6, %c0_7] : memref<32x64xbf16, #tpu.memory_space<vmem>>, vector<32x64xbf16>
    %c0_8 = arith.constant 0 : index
    %c0_9 = arith.constant 0 : index
    %5 = vector.load %arg12[%c0_8, %c0_9] : memref<64x512xbf16, #tpu.memory_space<vmem>>, vector<64x512xbf16>
    %cst = arith.constant dense<0.000000e+00> : vector<32x512xf32>
    %6 = tpu.matmul %4, %5, %cst {dimension_numbers = #tpu.dot_dimension_numbers<[1], [0], [0], [1], [0, 0, 1, 1], [], []>} : vector<32x64xbf16>, vector<64x512xbf16>, vector<32x512xf32> -> vector<32x512xf32>
    %c0_10 = arith.constant 0 : index
    %c0_11 = arith.constant 0 : index
    %7 = vector.load %arg4[%c0_10, %c0_11] : memref<32x1xf32, #tpu.memory_space<vmem>>, vector<32x1xf32>
    %8 = vector.broadcast %7 : vector<32x1xf32> to vector<32x512xf32>
    %9 = arith.addf %6, %8 : vector<32x512xf32>
    %cst_12 = arith.constant 0.000000e+00 : f32
    %10 = vector.broadcast %cst_12 : f32 to vector<32x512xf32>
    %11 = arith.maximumf %9, %10 : vector<32x512xf32>
    %c0_13 = arith.constant 0 : index
    %c0_14 = arith.constant 0 : index
    %12 = vector.load %arg5[%c0_13, %c0_14] : memref<16x32xbf16, #tpu.memory_space<vmem>>, vector<16x32xbf16>
    %13 = arith.truncf %11 : vector<32x512xf32> to vector<32x512xbf16>
    %cst_15 = arith.constant dense<0.000000e+00> : vector<16x512xf32>
    %14 = tpu.matmul %12, %13, %cst_15 {dimension_numbers = #tpu.dot_dimension_numbers<[1], [0], [0], [1], [0, 0, 1, 1], [], []>} : vector<16x32xbf16>, vector<32x512xbf16>, vector<16x512xf32> -> vector<16x512xf32>
    %c0_16 = arith.constant 0 : index
    %c0_17 = arith.constant 0 : index
    %15 = vector.load %arg6[%c0_16, %c0_17] : memref<16x1xf32, #tpu.memory_space<vmem>>, vector<16x1xf32>
    %16 = vector.broadcast %15 : vector<16x1xf32> to vector<16x512xf32>
    %17 = arith.addf %14, %16 : vector<16x512xf32>
    %cst_18 = arith.constant 0.000000e+00 : f32
    %18 = vector.broadcast %cst_18 : f32 to vector<16x512xf32>
    %19 = arith.maximumf %17, %18 : vector<16x512xf32>
    %c0_19 = arith.constant 0 : index
    %c0_20 = arith.constant 0 : index
    %20 = vector.load %arg7[%c0_19, %c0_20] : memref<8x16xbf16, #tpu.memory_space<vmem>>, vector<8x16xbf16>
    %21 = arith.truncf %19 : vector<16x512xf32> to vector<16x512xbf16>
    %cst_21 = arith.constant dense<0.000000e+00> : vector<8x512xf32>
    %22 = tpu.matmul %20, %21, %cst_21 {dimension_numbers = #tpu.dot_dimension_numbers<[1], [0], [0], [1], [0, 0, 1, 1], [], []>} : vector<8x16xbf16>, vector<16x512xbf16>, vector<8x512xf32> -> vector<8x512xf32>
    %c0_22 = arith.constant 0 : index
    %c0_23 = arith.constant 0 : index
    %23 = vector.load %arg8[%c0_22, %c0_23] : memref<8x1xf32, #tpu.memory_space<vmem>>, vector<8x1xf32>
    %24 = vector.broadcast %23 : vector<8x1xf32> to vector<8x512xf32>
    %25 = arith.addf %22, %24 : vector<8x512xf32>
    %cst_24 = arith.constant 0.000000e+00 : f32
    %26 = vector.broadcast %cst_24 : f32 to vector<8x512xf32>
    %27 = arith.maximumf %25, %26 : vector<8x512xf32>
    %c0_25 = arith.constant 0 : index
    %c0_26 = arith.constant 0 : index
    %28 = vector.load %arg9[%c0_25, %c0_26] : memref<8x1xf32, #tpu.memory_space<vmem>>, vector<8x1xf32>
    %29 = vector.broadcast %28 : vector<8x1xf32> to vector<8x512xf32>
    %30 = arith.mulf %27, %29 : vector<8x512xf32>
    %cst_27 = arith.constant dense<0.000000e+00> : vector<512xf32>
    %31 = vector.multi_reduction <add>, %30, %cst_27 [0] : vector<8x512xf32> to vector<512xf32>
    %32 = vector.shape_cast %31 : vector<512xf32> to vector<1x512xf32>
    %c0_28 = arith.constant 0 : index
    %c0_29 = arith.constant 0 : index
    %33 = vector.load %arg10[%c0_28, %c0_29] : memref<1x1xf32, #tpu.memory_space<vmem>>, vector<1x1xf32>
    %34 = vector.broadcast %33 : vector<1x1xf32> to vector<1x512xf32>
    %35 = arith.addf %32, %34 : vector<1x512xf32>
    %36 = arith.negf %35 : vector<1x512xf32>
    %37 = math.exp %36 : vector<1x512xf32>
    %cst_30 = arith.constant 1.000000e+00 : f32
    %38 = vector.broadcast %cst_30 : f32 to vector<1x512xf32>
    %39 = arith.addf %38, %37 : vector<1x512xf32>
    %40 = arith.divf %38, %39 : vector<1x512xf32>
    %c0_31 = arith.constant 0 : index
    %c0_32 = arith.constant 0 : index
    %41 = vector.load %arg11[%c0_31, %c0_32] : memref<1x512xf32, #tpu.memory_space<vmem>>, vector<1x512xf32>
    tpu.vector_store %arg11[%c0_31, %c0_32], %40 {strides = array<i32>} : memref<1x512xf32, #tpu.memory_space<vmem>>, vector<1x512xf32>,
    return
  }
  func.func @transform_0(%arg0: i32) -> (i32, i32) {
    %c0_i32 = arith.constant 0 : i32
    %c0_i32_0 = arith.constant 0 : i32
    return %c0_i32, %arg0 : i32, i32
  }
  func.func @transform_1(%arg0: i32) -> (i32, i32) {
    %c0_i32 = arith.constant 0 : i32
    %c0_i32_0 = arith.constant 0 : i32
    return %c0_i32, %arg0 : i32, i32
  }
  func.func @transform_2(%arg0: i32) -> (i32, i32) {
    %c0_i32 = arith.constant 0 : i32
    %c0_i32_0 = arith.constant 0 : i32
    %c0_i32_1 = arith.constant 0 : i32
    return %c0_i32, %c0_i32_0 : i32, i32
  }
  func.func @transform_3(%arg0: i32) -> (i32, i32) {
    %c0_i32 = arith.constant 0 : i32
    %c0_i32_0 = arith.constant 0 : i32
    %c0_i32_1 = arith.constant 0 : i32
    return %c0_i32, %c0_i32_0 : i32, i32
  }
  func.func @transform_4(%arg0: i32) -> (i32, i32) {
    %c0_i32 = arith.constant 0 : i32
    %c0_i32_0 = arith.constant 0 : i32
    %c0_i32_1 = arith.constant 0 : i32
    return %c0_i32, %c0_i32_0 : i32, i32
  }
  func.func @transform_5(%arg0: i32) -> (i32, i32) {
    %c0_i32 = arith.constant 0 : i32
    %c0_i32_0 = arith.constant 0 : i32
    %c0_i32_1 = arith.constant 0 : i32
    return %c0_i32, %c0_i32_0 : i32, i32
  }
  func.func @transform_6(%arg0: i32) -> (i32, i32) {
    %c0_i32 = arith.constant 0 : i32
    %c0_i32_0 = arith.constant 0 : i32
    %c0_i32_1 = arith.constant 0 : i32
    return %c0_i32, %c0_i32_0 : i32, i32
  }
  func.func @transform_7(%arg0: i32) -> (i32, i32) {
    %c0_i32 = arith.constant 0 : i32
    %c0_i32_0 = arith.constant 0 : i32
    %c0_i32_1 = arith.constant 0 : i32
    return %c0_i32, %c0_i32_0 : i32, i32
  }
  func.func @transform_8(%arg0: i32) -> (i32, i32) {
    %c0_i32 = arith.constant 0 : i32
    %c0_i32_0 = arith.constant 0 : i32
    %c0_i32_1 = arith.constant 0 : i32
    return %c0_i32, %c0_i32_0 : i32, i32
  }
  func.func @transform_9(%arg0: i32) -> (i32, i32) {
    %c0_i32 = arith.constant 0 : i32
    %c0_i32_0 = arith.constant 0 : i32
    %c0_i32_1 = arith.constant 0 : i32
    return %c0_i32, %c0_i32_0 : i32, i32
  }
  func.func @transform_10(%arg0: i32) -> (i32, i32) {
    %c0_i32 = arith.constant 0 : i32
    %c0_i32_0 = arith.constant 0 : i32
    return %c0_i32, %arg0 : i32, i32
  }
}

</mosaic_0001>

<bundles_post_ra>
// kernel: tpu_custom_call.1
= control target key start
LH: loop header
LB: loop body
LE: loop exit
PB: predicated region body
PF: predicated region fallthrough
CT: control target
= control target key end

     0   :  { %s1767_s0 = inlined_call_operand.hbm [shape: bf16[32,1024], index: 0, kind: input, shape index: {}]   ;;  %s1768_s1 = inlined_call_operand.hbm [shape: bf16[32,1024], index: 1, kind: input, shape index: {}]   ;;  %s1769_s2 = inlined_call_operand.vmem [shape: bf16[32,64], index: 2, kind: input, shape index: {}]   ;;  %s1770_s3 = inlined_call_operand.vmem [shape: f32[32,1], index: 3, kind: input, shape index: {}]   ;;  %s1771_s4 = inlined_call_operand.vmem [shape: bf16[16,32], index: 4, kind: input, shape index: {}]   ;;  %s1772_s5 = inlined_call_operand.vmem [shape: f32[16,1], index: 5, kind: input, shape index: {}]   ;;  %s1773_s6 = inlined_call_operand.vmem [shape: bf16[8,16], index: 6, kind: input, shape index: {}]   ;;  %s1774_s7 = inlined_call_operand.vmem [shape: f32[8,1], index: 7, kind: input, shape index: {}]   ;;  %s1775_s8 = inlined_call_operand.vmem [shape: f32[8,1], index: 8, kind: input, shape index: {}]   ;;  %s1776_s9 = inlined_call_operand.<no memory space> [shape: f32[1,1], index: 9, kind: input, shape index: {}]   ;;  %s1777_s10 = inlined_call_operand.hbm [shape: f32[1,1024], index: 10, kind: output, shape index: {}]  }
   0x1   :  { %1788 = sst [smem:[#allocation19_spill]] %s1767_s0  ;;  %v15_v0 = vstv %s1776_s9 }
   0x2   :  { %1789 = sst [smem:[#allocation20_spill]] %s1777_s10  ;;  %16 = vst [vmem:[#allocation3] sm:$0x1] %v15_v0 }
   0x3   :  { %17 = vsyncpa [#allocation5], 0 }
   0x4   :  { %19 = vsyncpa [#allocation5 + $0x1], 0 }
   0x5   :  { %20 = vsyncpa [#allocation8], 0 }
   0x6   :  { %22 = vsyncpa [#allocation8 + $0x1], 0 }
   0x7   :  { %23 = vsyncpa [#allocation6], 0 }
   0x8   :  { %25 = vsyncpa [#allocation6 + $0x1], 0  ;;  %s1510_s15 = smov 0   ;;  %s1512_s16 = smov 0  }
   0x9   :  { %s1514_s17 = smov 0   ;;  %s1516_s18 = smov 0  }
   0xa LB: > { %1790 = sst [smem:[#allocation13_spill]] %s1434_s15  ;;  %s1531_s9 = sadd.s32 4294967295, %s1446_s18   ;;  %s1446_s18 = sphi %s1516_s18, %s1813_s18   ;;  %s1442_s17 = sphi %s1514_s17, %s1815_s17   ;;  %s1438_s16 = sphi %s1512_s16, %s1817_s16   ;;  %s1434_s15 = sphi %s1510_s15, %s1816_s15  }
   0xb   : > { %1791 = sst [smem:[#allocation14_spill]] %s1442_s17  ;;  %s1108_s19 = sadd.s32 4294967294, %s1446_s18  }
   0xc   : > { %s1535_s20 = sadd.s32 1, %s1446_s18   ;;  %s38_s21 = sadd.s32 1, %s1442_s17 }
   0xd   : > { %1792 = sst [smem:[#allocation15_spill]] %s1535_s20  ;;  %s35_s22 = ssub.s32 %s1446_s18, %s1535_s20 }
   0xe   : > { %p45_p0 = scmp.ne.s32.totalorder %s1442_s17, %s1438_s16  ;;  %p36_p1 = scmp.eq.s32.totalorder %s35_s22, 0 }
   0xf   : > { %p46_p2 = scmp.eq.s32.totalorder %s1446_s18, 0  ;;  %p51_p3 = scmp.ne.s32.totalorder %s1438_s16, %s1434_s15 }
  0x10   : > { %p52_p4 = scmp.eq.s32.totalorder %s1531_s9, 0  ;;  %p269_p7 = scmp.eq.s32.totalorder %s1531_s9, 1 }
  0x11   : > { %s1547_s23 = scalar_select %p36_p1, %s1442_s17, %s38_s21  }
  0x12   : > { %p1549_p5 = por %p46_p2, %p45_p0  ;;  %p1553_p6 = por %p52_p4, %p51_p3 }
  0x13   : > { %1793 = sst [smem:[#allocation16_spill]] %s1547_s23  ;;  %p275_p8 = scmp.eq.s32.totalorder %s1108_s19, 1 }
  0x14   : > { %p1110_p9 = scmp.ge.s32.totalorder %s1446_s18, 2  ;;  %p1259_p10 = scmp.lt.s32.totalorder %s1446_s18, 2 }
  0x15   : > { %p1560_p11 = por %p269_p7, %p45_p0  ;;  %p1564_p12 = por %p275_p8, %p51_p3 }
  0x16   : > { %s1569_s28 = sand.u32 1, %s1442_s17   ;;  %s1782_s29 = sshll.u32 %s1446_s18, 4 }
  0x17   : > { %s1796_s26 = scalar_select %p1560_p11, 1, 0 }
  0x18   : > { %s1798_s27 = scalar_select %p1564_p12, 1, 0 }
  0x19   : > { %1797 = sst [smem:[#allocation17_spill]] %s1796_s26  ;;  %s1781_s30 = sshll.u32 %s1569_s28, 6 }
  0x1a   : > { %1799 = sst [smem:[#allocation18_spill]] %s1798_s27  ;;  %s323_s19 = scalar_lea.vmem [#allocation4], %s1781_s30 }
  0x1b   : > { %s1800_s0 = sld [smem:[#allocation19_spill]]  ;;  %s331_s21 = sshll.u32 %s323_s19, 4  ;;  %s332_s21 = int_to_ptr.vmem [resolvable:$true] %s331_s21 }
  0x1c   : > { %p1582_p13 = pnand %p1259_p10, %p1549_p5  ;;  %p1117_p0 = scmp.ge.s32.totalorder %s1446_s18, 1 }
  0x1d   : > { %s320_s23 = scalar_lea.sflag [#allocation5], %s1569_s28 }
  0x1e   : > { %p1320_p2 = pneg %p1582_p13 }
  0x21   : > { %s328_s13 = scalar_lea.hbm %s1800_s0, %s1782_s29  ;;  %s1323_s12 = scalar_lea.hbm %s1800_s0, 128 }
  0x22   : > { %s329_s14 = sshll.u32 %s328_s13, 4  ;;  %s330_s14 = int_to_ptr.hbm [resolvable:$true] %s329_s14 }
  0x23   : > { %s1316_s17 = sshra.s32 %s330_s14, 4  ;;  %s1317_s17 = int_to_ptr.hbm [resolvable:$true] %s1316_s17 }
  0x24   : > { %s1318_s20 = scalar_lea.hbm %s1317_s17, 64  ;;  %p1324_p5 = scmp.lt.s32.totalorder %s1317_s17, %s1800_s0 }
  0x25   : > { %p1319_p1 = scmp.ne.s32.totalorder %s1317_s17, %s1318_s20  ;;  %p1325_p7 = scmp.lt.s32.totalorder %s1323_s12, %s1318_s20 }
  0x27   : > { %p1321_p3 = pnand %p1320_p2, %p1319_p1  ;;  %p1326_p8 = por %p1325_p7, %p1324_p5 }
  0x29   : > { %p1322_p4 = pneg %p1321_p3 }
  0x2b   : > { %p1327_p10 = pnand %p1326_p8, %p1322_p4 }
  0x2d   : > { %1330 = shalt.err (!%p1327_p10)
}
  0x2e   : > { %s1448_s30 = smov 512   ;;  %s1449_s29 = smov 256  }
  0x2f   : > { %s1450_s27 = smov 16   ;;  %p361_p1 = scmp.lt.s32.totalorder %s1446_s18, 3 }
  0x30   : > { %1251 = dma.hbm_to_vmem [thread:$0]  (!%p1582_p13), %s330_s14, 1024, %s332_s21, %s320_s23, %s1448_s30, %s1449_s29, %s1450_s27  }
  0x31   : > { %s1802_s11 = sshll.u32 %s1446_s18, 4  ;;  %p1610_p3 = pnand %p1117_p0, %p361_p1 }
  0x32   : > { %s350_s24 = scalar_lea.hbm %s1768_s1, %s1802_s11  ;;  %s1804_s19 = sshll.u32 %s1569_s28, 6 }
  0x33   : > { %s351_s13 = sshll.u32 %s350_s24, 4  ;;  %s345_s0 = scalar_lea.vmem [#allocation7], %s1804_s19  ;;  %s352_s13 = int_to_ptr.hbm [resolvable:$true] %s351_s13 }
  0x34   : > { %s353_s15 = sshll.u32 %s345_s0, 4  ;;  %s342_s26 = scalar_lea.sflag [#allocation8], %s1569_s28  ;;  %s354_s15 = int_to_ptr.vmem [resolvable:$true] %s353_s15 }
  0x35   : > { %s1346_s10 = sshra.s32 %s352_s13, 4  ;;  %s1353_s11 = scalar_lea.hbm %s1768_s1, 128  ;;  %s1347_s10 = int_to_ptr.hbm [resolvable:$true] %s1346_s10 }
  0x36   : > { %s1348_s23 = scalar_lea.hbm %s1347_s10, 64  ;;  %p1354_p0 = scmp.lt.s32.totalorder %s1347_s10, %s1768_s1 }
  0x37   : > { %p1349_p4 = scmp.ne.s32.totalorder %s1347_s10, %s1348_s23  ;;  %p1355_p8 = scmp.lt.s32.totalorder %s1353_s11, %s1348_s23 }
  0x39   : > { %p1351_p5 = pnand %p1349_p4, %p1320_p2  ;;  %p1356_p10 = por %p1355_p8, %p1354_p0 }
  0x3b   : > { %p1352_p7 = pneg %p1351_p5 }
  0x3d   : > { %p1357_p1 = pnand %p1356_p10, %p1352_p7 }
  0x3f   : > { %1360 = shalt.err (!%p1357_p1)
}
  0x40   : > { %1254 = dma.hbm_to_vmem [thread:$0]  (!%p1582_p13), %s352_s13, 1024, %s354_s15, %s342_s26, %s1448_s30, %s1449_s29, %s1450_s27  }
  0x41   : > { %365 = sbr.rel (%p1610_p3) target bundleno = 608 (0x260), region = 60  ;;  %s1632_s0 = sand.u32 (!%p1610_p3), 1, %s1438_s16  }
  0x42   : > { %s1118_s28 = sshll.u32 (!%p1610_p3), %s1632_s0, 6  ;;  %s368_s24 = scalar_lea.sflag (!%p1610_p3), [#allocation5], %s1632_s0 }
  0x43   : > { %s1636_s10 = scalar_lea.vmem (!%p1610_p3), [#allocation4], %s1118_s28 }
  0x46   : > { %1421 = dma.done.wait (%p1553_p6), %s368_s24, 1024  }
  0x47   : > { %1423 = vsyncadd (%p1553_p6), %s368_s24, 4294966272  ;;  %s378_s15 = scalar_lea.sflag [#allocation8], %s1632_s0  ;;  %s381_s26 = scalar_lea.vmem [#allocation7], %s1118_s28 }
  0x48   : > { %1425 = dma.done.wait (%p1553_p6), %s378_s15, 1024  }
  0x49   : > { %1427 = vsyncadd (%p1553_p6), %s378_s15, 4294966272  ;;  %v1451_v1 = vmov 0   ;;  %v448_v2 = vld [vmem:[%s381_s26 + $0x20] sm:$0xff]  ;;  %v450_v3 = vld [vmem:[%s381_s26 + $0x30] sm:$0xff]  ;;  %vm594_vm0 = vcmask 523264   ;;  %vm720_vm1 = vcmask 261120  }
  0x4a   : > { %1298 = vset.pattern.permute.xlu1 %v1451_v1  ;;  %1297 = vset.pattern.permute.xlu0 %v1451_v1  ;;  %v449_v4 = vld [vmem:[%s381_s26 + $0x28] sm:$0xff]  ;;  %456 = vst [vmem:[#allocation2 + $0x60] sm:$0xff] %v448_v2  ;;  %v451_v5 = vld [vmem:[%s381_s26 + $0x38] sm:$0xff]  ;;  %v444_v6 = vld [vmem:[%s381_s26] sm:$0xff]  ;;  %vm799_vm2 = vcmask 130048   ;;  %vm987_vm8 = vcmask 1040384  }
  0x4b   : > { %1299 = vset.pattern.permute.xlu2 %v1451_v1  ;;  %458 = vst [vmem:[#allocation2 + $0x70] sm:$0xff] %v450_v3  ;;  %v446_v7 = vld [vmem:[%s381_s26 + $0x10] sm:$0xff]  ;;  %v445_v8 = vld [vmem:[%s381_s26 + $0x8] sm:$0xff]  ;;  %v447_v9 = vld [vmem:[%s381_s26 + $0x18] sm:$0xff]  ;;  %s1120_s12 = sshll.u32 %s1632_s0, 2  ;;  %s1218_s13 = sshll.u32 %s1531_s9, 2 }
  0x4c   : > { %457 = vst [vmem:[#allocation2 + $0x68] sm:$0xff] %v449_v4  ;;  %v432_v10 = vld [vmem:[%s1636_s10 + $0x20] sm:$0xff]  ;;  %v434_v11 = vld [vmem:[%s1636_s10 + $0x30] sm:$0xff]  ;;  %v433_v12 = vld [vmem:[%s1636_s10 + $0x28] sm:$0xff]  ;;  %s1809_s23 = sld [smem:[#allocation20_spill]]  ;;  %s423_s21 = scalar_lea.vmem [#allocation9], %s1120_s12 }
  0x4d   : > { %459 = vst [vmem:[#allocation2 + $0x78] sm:$0xff] %v451_v5  ;;  %v435_v15 = vld [vmem:[%s1636_s10 + $0x38] sm:$0xff]  ;;  %v428_v18 = vld [vmem:[%s1636_s10] sm:$0xff]  ;;  %v430_v23 = vld [vmem:[%s1636_s10 + $0x10] sm:$0xff]  ;;  %s1012_s11 = sshll.u32 %s423_s21, 4  ;;  %s1000_s28 = scalar_lea.sflag [#allocation6], %s1632_s0  ;;  %s1013_s11 = int_to_ptr.vmem [resolvable:$true] %s1012_s11 }
  0x4e   : > { %452 = vst [vmem:[#allocation2 + $0x40] sm:$0xff] %v444_v6  ;;  %v429_v26 = vld [vmem:[%s1636_s10 + $0x8] sm:$0xff]  ;;  %v431_v31 = vld [vmem:[%s1636_s10 + $0x18] sm:$0xff] }
  0x4f   : > { %454 = vst [vmem:[#allocation2 + $0x50] sm:$0xff] %v446_v7  ;;  %v482_v34 = vld [vmem:[%s1770_s3 + $0x10] sm:$0xff]  ;;  %v480_v39 = vld [vmem:[%s1770_s3] sm:$0xff]  ;;  %v483_v54 = vld [vmem:[%s1770_s3 + $0x18] sm:$0xff] }
  0x50   : > { %453 = vst [vmem:[#allocation2 + $0x48] sm:$0xff] %v445_v8  ;;  %496 = vperm.xlu0 %1297, %v482_v34   ;;  %486 = vperm.xlu1 %1298, %v480_v39   ;;  %v481_v59 = vld [vmem:[%s1770_s3 + $0x8] sm:$0xff]  ;;  %v1223_v4 = vld [vmem:[%s1769_s2] sm:$0xff] }
  0x51   : > { %v1179_v13 = vld [vmem:[#allocation2 + $0x60] sm:$0xf]  ;;  %v1237_v14 = vld [vmem:[#allocation2 + $0x64] sm:$0xf]  ;;  %455 = vst [vmem:[#allocation2 + $0x58] sm:$0xff] %v447_v9  ;;  %v1224_v9 = vld [vmem:[%s1769_s2 + $0x8] sm:$0xff] }
  0x52   : > { %v1239_v16 = vld [vmem:[#allocation2 + $0x6c] sm:$0xf0]  ;;  %v1181_v17 = vld [vmem:[#allocation2 + $0x70] sm:$0xf0]  ;;  %440 = vst [vmem:[#allocation2 + $0x20] sm:$0xff] %v432_v10  ;;  %v793_v7 = vld [vmem:[%s1774_s7] sm:$0xff]  ;;  %s1010_s14 = scalar_lea.hbm %s1809_s23, %s1218_s13 }
  0x53   : > { %v1180_v19 = vor.u32 %v1239_v16, %v1179_v13  ;;  %v1184_v20 = vor.u32 %v1237_v14, %v1181_v17  ;;  %v1187_v21 = vld [vmem:[#allocation2 + $0x68] sm:$0xf]  ;;  %v1238_v22 = vld [vmem:[#allocation2 + $0x6c] sm:$0xf]  ;;  %442 = vst [vmem:[#allocation2 + $0x30] sm:$0xff] %v434_v11  ;;  %v859_v8 = vld [vmem:[%s1775_s8] sm:$0xff] }
  0x54   : > { %v1240_v24 = vld [vmem:[#allocation2 + $0x74] sm:$0xf0]  ;;  %v1189_v25 = vld [vmem:[#allocation2 + $0x78] sm:$0xf0]  ;;  %441 = vst [vmem:[#allocation2 + $0x28] sm:$0xff] %v433_v12  ;;  %s1014_s17 = sshll.u32 %s1010_s14, 4  ;;  %s1015_s17 = int_to_ptr.hbm [resolvable:$true] %s1014_s17 }
  0x55   : > { %605 = vmatpush.bf16.msra.mxu0 %v1180_v19  ;;  %624 = vmatpush.bf16.msra.mxu1 %v1184_v20  ;;  %v1188_v27 = vor.u32 %v1240_v24, %v1187_v21  ;;  %v1192_v28 = vor.u32 %v1238_v22, %v1189_v25  ;;  %v1163_v29 = vld [vmem:[#allocation2 + $0x40] sm:$0xf]  ;;  %v1233_v30 = vld [vmem:[#allocation2 + $0x44] sm:$0xf]  ;;  %443 = vst [vmem:[#allocation2 + $0x38] sm:$0xff] %v435_v15  ;;  %s1390_s24 = sshra.s32 %s1015_s17, 4  ;;  %s1391_s24 = int_to_ptr.hbm [resolvable:$true] %s1390_s24 }
  0x56   : > { %v1235_v32 = vld [vmem:[#allocation2 + $0x4c] sm:$0xf0]  ;;  %v1165_v33 = vld [vmem:[#allocation2 + $0x50] sm:$0xf0]  ;;  %436 = vst [vmem:[#allocation2] sm:$0xff] %v428_v18  ;;  %v703_v18 = vld [vmem:[%s1772_s5] sm:$0xff]  ;;  %p1397_p3 = scmp.lt.s32.totalorder %s1391_s24, %s1809_s23 }
  0x57   : > { %643 = vmatpush.bf16.msra.mxu2 %v1188_v27  ;;  %662 = vmatpush.bf16.msra.mxu3 %v1192_v28  ;;  %v1164_v35 = vor.u32 %v1235_v32, %v1163_v29  ;;  %v1168_v36 = vor.u32 %v1233_v30, %v1165_v33  ;;  %v1171_v37 = vld [vmem:[#allocation2 + $0x48] sm:$0xf]  ;;  %v1234_v38 = vld [vmem:[#allocation2 + $0x4c] sm:$0xf]  ;;  %438 = vst [vmem:[#allocation2 + $0x10] sm:$0xff] %v430_v23  ;;  %s1392_s10 = scalar_lea.hbm %s1391_s24, 4 }
  0x58   : > { %v1236_v40 = vld [vmem:[#allocation2 + $0x54] sm:$0xf0]  ;;  %v1173_v41 = vld [vmem:[#allocation2 + $0x58] sm:$0xf0]  ;;  %437 = vst [vmem:[#allocation2 + $0x8] sm:$0xff] %v429_v26  ;;  %501 = vperm.xlu0 %1297, %v483_v54   ;;  %491 = vperm.xlu1 %1298, %v481_v59   ;;  %v704_v23 = vld [vmem:[%s1772_s5 + $0x8] sm:$0xff]  ;;  %p1393_p6 = scmp.ne.s32.totalorder %s1391_s24, %s1392_s10 }
  0x59   : > { %606 = vmatpush.bf16.msra.mxu0 %v1164_v35  ;;  %625 = vmatpush.bf16.msra.mxu1 %v1168_v36  ;;  %v1172_v42 = vor.u32 %v1236_v40, %v1171_v37  ;;  %v1176_v43 = vor.u32 %v1234_v38, %v1173_v41  ;;  %v1147_v44 = vld [vmem:[#allocation2 + $0x20] sm:$0xf]  ;;  %v1229_v45 = vld [vmem:[#allocation2 + $0x24] sm:$0xf]  ;;  %439 = vst [vmem:[#allocation2 + $0x18] sm:$0xff] %v431_v31  ;;  %s1396_s25 = scalar_lea.hbm %s1809_s23, 8 }
  0x5a   : > { %v1231_v46 = vld [vmem:[#allocation2 + $0x2c] sm:$0xf0]  ;;  %v1149_v47 = vld [vmem:[#allocation2 + $0x30] sm:$0xf0]  ;;  %707 = vperm.xlu2 %1299, %v703_v18   ;;  %p1394_p13 = pnand %p1393_p6, %p1560_p11  ;;  %p1398_p4 = scmp.lt.s32.totalorder %s1396_s25, %s1392_s10 }
  0x5b   : > { %644 = vmatpush.bf16.msra.mxu2 %v1172_v42  ;;  %663 = vmatpush.bf16.msra.mxu3 %v1176_v43  ;;  %v1148_v48 = vor.u32 %v1231_v46, %v1147_v44  ;;  %v1152_v49 = vor.u32 %v1229_v45, %v1149_v47  ;;  %v1155_v50 = vld [vmem:[#allocation2 + $0x28] sm:$0xf]  ;;  %v1230_v51 = vld [vmem:[#allocation2 + $0x2c] sm:$0xf]  ;;  %v893_v42 = vld [vmem:[#allocation3] sm:$0x1] }
  0x5c   : > { %v1232_v52 = vld [vmem:[#allocation2 + $0x34] sm:$0xf0]  ;;  %v1157_v53 = vld [vmem:[#allocation2 + $0x38] sm:$0xf0]  ;;  %p1395_p2 = pneg %p1394_p13  ;;  %p1399_p5 = por %p1398_p4, %p1397_p3 }
  0x5d   : > { %607 = vmatpush.bf16.msra.mxu0 %v1148_v48  ;;  %626 = vmatpush.bf16.msra.mxu1 %v1152_v49  ;;  %v1156_v55 = vor.u32 %v1232_v52, %v1155_v50  ;;  %v1160_v56 = vor.u32 %v1230_v51, %v1157_v53  ;;  %v1131_v57 = vld [vmem:[#allocation2] sm:$0xf]  ;;  %v1225_v58 = vld [vmem:[#allocation2 + $0x4] sm:$0xf] }
  0x5e   : > { %v1227_v60 = vld [vmem:[#allocation2 + $0xc] sm:$0xf0]  ;;  %v1133_v61 = vld [vmem:[#allocation2 + $0x10] sm:$0xf0]  ;;  %p1400_p7 = pnand %p1399_p5, %p1395_p2 }
  0x5f   : > { %645 = vmatpush.bf16.msra.mxu2 %v1156_v55  ;;  %664 = vmatpush.bf16.msra.mxu3 %v1160_v56  ;;  %v1132_v62 = vor.u32 %v1227_v60, %v1131_v57  ;;  %v1136_v63 = vor.u32 %v1225_v58, %v1133_v61  ;;  %v1139_v0 = vld [vmem:[#allocation2 + $0x8] sm:$0xf]  ;;  %v1226_v1 = vld [vmem:[#allocation2 + $0xc] sm:$0xf] }
  0x60   : > { %v1228_v2 = vld [vmem:[#allocation2 + $0x14] sm:$0xf0]  ;;  %v1141_v3 = vld [vmem:[#allocation2 + $0x18] sm:$0xf0]  ;;  %796 = vperm.xlu0 %1297, %v793_v7   ;;  %862 = vperm.xlu1 %1298, %v859_v8  }
  0x61   : > { %608 = vmatpush.bf16.msra.mxu0 %v1132_v62  ;;  %627 = vmatpush.bf16.msra.mxu1 %v1136_v63  ;;  %v1140_v5 = vor.u32 %v1228_v2, %v1139_v0  ;;  %v1144_v6 = vor.u32 %v1226_v1, %v1141_v3  ;;  %v1241_v1 = vld [vmem:[%s1771_s4] sm:$0xff] }
  0x62   : > { %712 = vperm.xlu2 %1299, %v704_v23  }
  0x63   : > { %646 = vmatpush.bf16.msra.mxu2 %v1140_v5  ;;  %665 = vmatpush.bf16.msra.mxu3 %v1144_v6 }
  0x64   : > { %1193 = vmatmul.msk.bf16.vlgmr.msra.gmra.mxu0 %vm594_vm0, %v1223_v4  ;;  %1195 = vmatmul.msk.bf16.vlgmr.msra.gmra.mxu1 %vm594_vm0, %v1223_v4 }
  0x66   : > { %1197 = vmatmul.msk.bf16.vlgmr.msra.gmra.mxu2 %vm594_vm0, %v1223_v4  ;;  %1199 = vmatmul.msk.bf16.vlgmr.msra.gmra.mxu3 %vm594_vm0, %v1223_v4 }
  0x6a   : > { %896 = vperm.xlu2 %1299, %v893_v42  }
  0x74   : > { %1194 = vmatmul.msk.bf16.gmra.mxu0 %vm594_vm0, %v1224_v9  ;;  %1196 = vmatmul.msk.bf16.gmra.mxu1 %vm594_vm0, %v1224_v9 }
  0x76   : > { %1198 = vmatmul.msk.bf16.gmra.mxu2 %vm594_vm0, %v1224_v9  ;;  %1200 = vmatmul.msk.bf16.gmra.mxu3 %vm594_vm0, %v1224_v9 }
  0xc2   : > { %v497_v16 = vpop.permute.xlu0 %496  ;;  %v487_v17 = vpop.permute.xlu1 %486 }
  0xca   : > { %v502_v24 = vpop.permute.xlu0 %501  ;;  %v492_v25 = vpop.permute.xlu1 %491 }
  0xe1   : > { %v610_v10 = vpop.f32.mrf.mxu0  ;;  %v629_v11 = vpop.f32.mrf.mxu1 }
  0xe2   : > { %v611_v32 = vadd.f32 %v610_v10, %v487_v17  ;;  %v630_v33 = vadd.f32 %v629_v11, %v487_v17  ;;  %v708_v10 = vpop.permute.xlu2 %707 }
  0xe4   : > { %v677_v43 = vmax.f32 %v611_v32, 0.0  ;;  %v678_v44 = vmax.f32 %v630_v33, 0.0 }
  0xe9   : > { %v648_v12 = vpop.f32.mrf.mxu2  ;;  %v667_v13 = vpop.f32.mrf.mxu3 }
  0xea   : > { %v612_v14 = vpop.f32.mrf.mxu0  ;;  %v631_v15 = vpop.f32.mrf.mxu1  ;;  %v649_v57 = vadd.f32 %v648_v12, %v487_v17  ;;  %v668_v58 = vadd.f32 %v667_v13, %v487_v17 }
  0xeb   : > { %v613_v36 = vadd.f32 %v612_v14, %v492_v25  ;;  %v632_v37 = vadd.f32 %v631_v15, %v492_v25  ;;  %v713_v15 = vpop.permute.xlu2 %712 }
  0xec   : > { %v679_v6 = vmax.f32 %v649_v57, 0.0  ;;  %v680_v7 = vmax.f32 %v668_v58, 0.0 }
  0xed   : > { %v681_v47 = vmax.f32 %v613_v36, 0.0  ;;  %v682_v48 = vmax.f32 %v632_v37, 0.0 }
  0xef   : > { %v695_v59 = vpack.c.bf16 %v681_v47, %v677_v43  ;;  %v696_v60 = vpack.c.bf16 %v682_v48, %v678_v44  ;;  %v863_v48 = vpop.permute.xlu1 %862 }
  0xf1   : > { %v650_v19 = vpop.f32.mrf.mxu2  ;;  %v669_v20 = vpop.f32.mrf.mxu3 }
  0xf2   : > { %v615_v21 = vpop.f32.mrf.mxu0  ;;  %v634_v22 = vpop.f32.mrf.mxu1  ;;  %v651_v53 = vadd.f32 %v650_v19, %v492_v25  ;;  %v670_v54 = vadd.f32 %v669_v20, %v492_v25 }
  0xf3   : > { %v616_v26 = vadd.f32 %v615_v21, %v497_v16  ;;  %v635_v27 = vadd.f32 %v634_v22, %v497_v16 }
  0xf4   : > { %v683_v2 = vmax.f32 %v651_v53, 0.0  ;;  %v684_v3 = vmax.f32 %v670_v54, 0.0 }
  0xf5   : > { %v685_v38 = vmax.f32 %v616_v26, 0.0  ;;  %v686_v39 = vmax.f32 %v635_v27, 0.0 }
  0xf6   : > { %v697_v8 = vpack.c.bf16 %v683_v2, %v679_v6  ;;  %v698_v9 = vpack.c.bf16 %v684_v3, %v680_v7 }
  0xf9   : > { %v653_v28 = vpop.f32.mrf.mxu2  ;;  %v672_v29 = vpop.f32.mrf.mxu3 }
  0xfa   : > { %v617_v30 = vpop.f32.mrf.mxu0  ;;  %v636_v31 = vpop.f32.mrf.mxu1  ;;  %v654_v49 = vadd.f32 %v653_v28, %v497_v16  ;;  %v673_v50 = vadd.f32 %v672_v29, %v497_v16  ;;  %v788_v28 = vld [vmem:[%s1773_s6] sm:$0xf] }
  0xfb   : > { %v618_v34 = vadd.f32 %v617_v30, %v502_v24  ;;  %v637_v35 = vadd.f32 %v636_v31, %v502_v24 }
  0xfc   : > { %v687_v61 = vmax.f32 %v654_v49, 0.0  ;;  %v688_v62 = vmax.f32 %v673_v50, 0.0 }
  0xfd   : > { %v689_v40 = vmax.f32 %v618_v34, 0.0  ;;  %v690_v41 = vmax.f32 %v637_v35, 0.0 }
  0xff   : > { %v699_v45 = vpack.c.bf16 %v689_v40, %v685_v38  ;;  %v700_v46 = vpack.c.bf16 %v690_v41, %v686_v39  ;;  %v797_v41 = vpop.permute.xlu0 %796 }
 0x101   : > { %v655_v51 = vpop.f32.mrf.mxu2  ;;  %v674_v52 = vpop.f32.mrf.mxu3  ;;  %730 = vmatpush.bf16.msrb.mxu0 %v699_v45  ;;  %744 = vmatpush.bf16.msrb.mxu1 %v700_v46 }
 0x102   : > { %v656_v55 = vadd.f32 %v655_v51, %v502_v24  ;;  %v675_v56 = vadd.f32 %v674_v52, %v502_v24 }
 0x104   : > { %v691_v63 = vmax.f32 %v656_v55, 0.0  ;;  %v692_v0 = vmax.f32 %v675_v56, 0.0 }
 0x105   : > { %731 = vmatpush.bf16.msrb.mxu0 %v695_v59  ;;  %745 = vmatpush.bf16.msrb.mxu1 %v696_v60 }
 0x106   : > { %v701_v4 = vpack.c.bf16 %v691_v63, %v687_v61  ;;  %v702_v5 = vpack.c.bf16 %v692_v0, %v688_v62  ;;  %v897_v61 = vpop.permute.xlu2 %896 }
 0x107   : > { %v899_v0 = vperm.slane %v897_v61, 0 }
 0x108   : > { %758 = vmatpush.bf16.msrb.mxu2 %v701_v4  ;;  %772 = vmatpush.bf16.msrb.mxu3 %v702_v5 }
 0x109   : > { %1205 = vmatmul.msk.bf16.vlgmr.msrb.gmra.mxu0 %vm720_vm1, %v1241_v1  ;;  %1206 = vmatmul.msk.bf16.vlgmr.msrb.gmra.mxu1 %vm720_vm1, %v1241_v1 }
 0x10c   : > { %759 = vmatpush.bf16.msrb.mxu2 %v697_v8  ;;  %773 = vmatpush.bf16.msrb.mxu3 %v698_v9 }
 0x10f   : > { %1207 = vmatmul.msk.bf16.vlgmr.msrb.gmra.mxu2 %vm720_vm1, %v1241_v1  ;;  %1208 = vmatmul.msk.bf16.vlgmr.msrb.gmra.mxu3 %vm720_vm1, %v1241_v1 }
 0x186   : > { %v733_v11 = vpop.f32.mrf.mxu0  ;;  %v747_v12 = vpop.f32.mrf.mxu1 }
 0x187   : > { %v734_v13 = vadd.f32 %v733_v11, %v708_v10  ;;  %v748_v14 = vadd.f32 %v747_v12, %v708_v10 }
 0x189   : > { %v780_v18 = vmax.f32 %v734_v13, 0.0  ;;  %v781_v19 = vmax.f32 %v748_v14, 0.0 }
 0x18e   : > { %v735_v16 = vpop.f32.mrf.mxu0  ;;  %v749_v17 = vpop.f32.mrf.mxu1 }
 0x18f   : > { %v736_v20 = vadd.f32 %v735_v16, %v713_v15  ;;  %v750_v21 = vadd.f32 %v749_v17, %v713_v15 }
 0x191   : > { %v784_v22 = vmax.f32 %v736_v20, 0.0  ;;  %v785_v23 = vmax.f32 %v750_v21, 0.0 }
 0x192   : > { %v761_v24 = vpop.f32.mrf.mxu2  ;;  %v775_v25 = vpop.f32.mrf.mxu3 }
 0x193   : > { %v789_v26 = vpack.c.bf16 %v784_v22, %v780_v18  ;;  %v790_v27 = vpack.c.bf16 %v785_v23, %v781_v19  ;;  %v762_v29 = vadd.f32 %v761_v24, %v708_v10  ;;  %v776_v30 = vadd.f32 %v775_v25, %v708_v10 }
 0x195   : > { %810 = vmatpush.bf16.msra.mxu0 %v789_v26  ;;  %823 = vmatpush.bf16.msra.mxu1 %v790_v27  ;;  %v782_v35 = vmax.f32 %v762_v29, 0.0  ;;  %v783_v36 = vmax.f32 %v776_v30, 0.0 }
 0x198   : > { %1209 = vmatmul.msk.bf16.vlgmr.msra.gmra.mxu0 %vm799_vm2, %v788_v28  ;;  %1210 = vmatmul.msk.bf16.vlgmr.msra.gmra.mxu1 %vm799_vm2, %v788_v28 }
 0x19a   : > { %v763_v31 = vpop.f32.mrf.mxu2  ;;  %v777_v32 = vpop.f32.mrf.mxu3 }
 0x19b   : > { %v764_v33 = vadd.f32 %v763_v31, %v713_v15  ;;  %v778_v34 = vadd.f32 %v777_v32, %v713_v15 }
 0x19d   : > { %v786_v37 = vmax.f32 %v764_v33, 0.0  ;;  %v787_v38 = vmax.f32 %v778_v34, 0.0 }
 0x19f   : > { %v791_v39 = vpack.c.bf16 %v786_v37, %v782_v35  ;;  %v792_v40 = vpack.c.bf16 %v787_v38, %v783_v36 }
 0x1a1   : > { %836 = vmatpush.bf16.msra.mxu2 %v791_v39  ;;  %849 = vmatpush.bf16.msra.mxu3 %v792_v40 }
 0x1a4   : > { %1211 = vmatmul.msk.bf16.vlgmr.msra.gmra.mxu2 %vm799_vm2, %v788_v28  ;;  %1212 = vmatmul.msk.bf16.vlgmr.msra.gmra.mxu3 %vm799_vm2, %v788_v28 }
 0x215   : > { %v812_v42 = vpop.f32.mrf.mxu0  ;;  %v825_v43 = vpop.f32.mrf.mxu1 }
 0x216   : > { %v813_v44 = vadd.f32 %v812_v42, %v797_v41  ;;  %v826_v45 = vadd.f32 %v825_v43, %v797_v41 }
 0x218   : > { %v855_v46 = vmax.f32 %v813_v44, 0.0  ;;  %v856_v47 = vmax.f32 %v826_v45, 0.0 }
 0x21a   : > { %v865_v49 = vmul.f32 %v863_v48, %v855_v46  ;;  %v866_v50 = vmul.f32 %v863_v48, %v856_v47 }
 0x21c   : > { %v869_v51 = vrot.slane %v865_v49, 4  ;;  %v875_v52 = vrot.slane %v866_v50, 4 }
 0x21d   : > { %v827_v53 = vpop.f32.mrf.mxu1  ;;  %v814_v54 = vpop.f32.mrf.mxu0 }
 0x21e   : > { %v870_v55 = vadd.f32 %v869_v51, %v865_v49  ;;  %v876_v56 = vadd.f32 %v875_v52, %v866_v50 }
 0x220   : > { %v871_v57 = vrot.slane %v870_v55, 2  ;;  %v877_v58 = vrot.slane %v876_v56, 2 }
 0x222   : > { %v872_v59 = vadd.f32 %v871_v57, %v870_v55  ;;  %v878_v60 = vadd.f32 %v877_v58, %v876_v56 }
 0x224   : > { %v873_v62 = vrot.slane %v872_v59, 1  ;;  %v879_v63 = vrot.slane %v878_v60, 1 }
 0x226   : > { %v874_v1 = vadd.f32 %v873_v62, %v872_v59  ;;  %v880_v2 = vadd.f32 %v879_v63, %v878_v60 }
 0x227   : > { %v838_v3 = vpop.f32.mrf.mxu2  ;;  %v851_v4 = vpop.f32.mrf.mxu3 }
 0x228   : > { %v900_v5 = vadd.f32 %v899_v0, %v874_v1  ;;  %v901_v6 = vadd.f32 %v899_v0, %v880_v2  ;;  %v839_v7 = vadd.f32 %v838_v3, %v797_v41  ;;  %v852_v8 = vadd.f32 %v851_v4, %v797_v41 }
 0x22a   : > { %v1214_v9 = vmul.f32 -1.442695, %v901_v6  ;;  %v857_v10 = vmax.f32 %v839_v7, 0.0  ;;  %v858_v11 = vmax.f32 %v852_v8, 0.0  ;;  %v1213_v12 = vmul.f32 -1.442695, %v900_v5 }
 0x22c   : > { %v867_v13 = vmul.f32 %v863_v48, %v857_v10  ;;  %v868_v14 = vmul.f32 %v863_v48, %v858_v11  ;;  %1300 = vpow2.f32 %v1214_v9  ;;  %v994_v11 = vlaneseq }
 0x22d   : > { %1302 = vpow2.f32 %v1213_v12 }
 0x22e   : > { %v881_v15 = vrot.slane %v867_v13, 4  ;;  %v887_v16 = vrot.slane %v868_v14, 4 }
 0x22f   : > { %v840_v17 = vpop.f32.mrf.mxu2  ;;  %v853_v18 = vpop.f32.mrf.mxu3 }
 0x230   : > { %v882_v19 = vadd.f32 %v881_v15, %v867_v13  ;;  %v888_v20 = vadd.f32 %v887_v16, %v868_v14 }
 0x232   : > { %v883_v21 = vrot.slane %v882_v19, 2  ;;  %v889_v22 = vrot.slane %v888_v20, 2  ;;  %v1301_v23 = vpop.eup %1300 }
 0x233   : > { %v917_v24 = vadd.f32 1.0, %v1301_v23  ;;  %v1303_v27 = vpop.eup %1302 }
 0x234   : > { %v884_v25 = vadd.f32 %v883_v21, %v882_v19  ;;  %v890_v26 = vadd.f32 %v889_v22, %v888_v20  ;;  %v1699_v30 = vadd.f32 1.0, %v1303_v27 }
 0x235   : > { %1304 = vrcp.f32 %v917_v24  ;;  %v946_v48 = vand.u32 2147483648, %v917_v24  ;;  %vm940_vm5 = vweird.f32 %v917_v24  ;;  %v944_v55 = vand.u32 2147483647, %v917_v24 }
 0x236   : > { %v885_v28 = vrot.slane %v884_v25, 1  ;;  %v891_v29 = vrot.slane %v890_v26, 1  ;;  %1306 = vrcp.f32 %v1699_v30  ;;  %vm925_vm4 = vweird.f32 %v1699_v30 }
 0x237   : > { %v929_v57 = vand.u32 2147483647, %v1699_v30  ;;  %v947_v59 = vor.u32 1.1754944e-38, %v946_v48  ;;  %vm945_vm10 = vcmp.eq.f32.partialorder %v944_v55, 8.507059e+37  ;;  %v931_v6 = vand.u32 2147483648, %v1699_v30 }
 0x238   : > { %v886_v31 = vadd.f32 %v885_v28, %v884_v25  ;;  %v892_v32 = vadd.f32 %v891_v29, %v890_v26 }
 0x239   : > { %v932_v18 = vor.u32 1.1754944e-38, %v931_v6 }
 0x23a   : > { %v902_v33 = vadd.f32 %v899_v0, %v886_v31  ;;  %v903_v34 = vadd.f32 %v899_v0, %v892_v32 }
 0x23b   : > { %v1305_v37 = vpop.eup %1304 }
 0x23c   : > { %v1215_v35 = vmul.f32 -1.442695, %v902_v33  ;;  %v1216_v36 = vmul.f32 -1.442695, %v903_v34  ;;  %v936_v38 = vmul.f32 %v1305_v37, %v917_v24  ;;  %v1702_v39 = vpop.eup %1306  ;;  %vm941_vm3 = vweird.f32 %v1305_v37 }
 0x23d   : > { %v921_v44 = vmul.f32 %v1702_v39, %v1699_v30  ;;  %vm926_vm6 = vweird.f32 %v1702_v39  ;;  %vm1710_vm7 = vmor %vm940_vm5, %vm941_vm3  ;;  %vm989_vm3 = vcmask 1042434   ;;  %vm991_vm5 = vcmask 1041408  }
 0x23e   : > { %1308 = vpow2.f32 %v1215_v35  ;;  %v937_v42 = vsub.f32 1.0, %v936_v38  ;;  %vm1723_vm12 = vmor %vm925_vm4, %vm926_vm6  ;;  %vm930_vm4 = vcmp.eq.f32.partialorder %v929_v57, 8.507059e+37  ;;  %vm996_vm6 = vcmp.lt.s32.totalorder %v994_v11, 512 }
 0x23f   : > { %1310 = vpow2.f32 %v1216_v36  ;;  %v922_v46 = vsub.f32 1.0, %v921_v44 }
 0x240   : > { %v938_v47 = vmul.f32 %v1305_v37, %v937_v42 }
 0x241   : > { %v923_v50 = vmul.f32 %v1702_v39, %v922_v46 }
 0x242   : > { %v939_v51 = vadd.f32 %v1305_v37, %v938_v47 }
 0x243   : > { %v924_v61 = vadd.f32 %v1702_v39, %v923_v50 }
 0x244   : > { %v1309_v40 = vpop.eup %1308  ;;  %v943_v62 = vsel %vm1710_vm7, %v1305_v37, %v939_v51 }
 0x245   : > { %v1311_v41 = vpop.eup %1310  ;;  %v918_v43 = vadd.f32 1.0, %v1309_v40  ;;  %v948_v7 = vsel %vm945_vm10, %v947_v59, %v943_v62  ;;  %v928_v12 = vsel %vm1723_vm12, %v1702_v39, %v924_v61 }
 0x246   : > { %v919_v45 = vadd.f32 1.0, %v1311_v41  ;;  %v984_v17 = vrot.slane %v948_v7, 7  ;;  %v933_v22 = vsel %vm930_vm4, %v932_v18, %v928_v12 }
 0x247   : > { %1312 = vrcp.f32 %v918_v43  ;;  %v961_v63 = vand.u32 2147483648, %v918_v43  ;;  %v959_v1 = vand.u32 2147483647, %v918_v43  ;;  %vm955_vm13 = vweird.f32 %v918_v43 }
 0x248   : > { %1314 = vrcp.f32 %v919_v45  ;;  %v976_v2 = vand.u32 2147483648, %v919_v45  ;;  %v974_v4 = vand.u32 2147483647, %v919_v45  ;;  %vm970_vm15 = vweird.f32 %v919_v45 }
 0x249   : > { %v962_v9 = vor.u32 1.1754944e-38, %v961_v63  ;;  %vm960_vm0 = vcmp.eq.f32.partialorder %v959_v1, 8.507059e+37  ;;  %v988_v23 = vsel %vm987_vm8, %v933_v22, %v984_v17 }
 0x24a   : > { %v977_v14 = vor.u32 1.1754944e-38, %v976_v2  ;;  %vm975_vm2 = vcmp.eq.f32.partialorder %v974_v4, 8.507059e+37 }
 0x24d   : > { %v1313_v49 = vpop.eup %1312 }
 0x24e   : > { %v1315_v52 = vpop.eup %1314  ;;  %v951_v53 = vmul.f32 %v1313_v49, %v918_v43  ;;  %vm956_vm9 = vweird.f32 %v1313_v49 }
 0x24f   : > { %v966_v54 = vmul.f32 %v1315_v52, %v919_v45  ;;  %vm971_vm11 = vweird.f32 %v1315_v52  ;;  %vm957_vm14 = vmor %vm955_vm13, %vm956_vm9 }
 0x250   : > { %v952_v56 = vsub.f32 1.0, %v951_v53  ;;  %vm972_vm1 = vmor %vm970_vm15, %vm971_vm11 }
 0x251   : > { %v967_v60 = vsub.f32 1.0, %v966_v54 }
 0x252   : > { %v953_v0 = vmul.f32 %v1313_v49, %v952_v56 }
 0x253   : > { %v968_v3 = vmul.f32 %v1315_v52, %v967_v60 }
 0x254   : > { %v954_v8 = vadd.f32 %v1313_v49, %v953_v0 }
 0x255   : > { %v969_v10 = vadd.f32 %v1315_v52, %v968_v3 }
 0x256   : > { %v958_v13 = vsel %vm957_vm14, %v1313_v49, %v954_v8 }
 0x257   : > { %v963_v15 = vsel %vm960_vm0, %v962_v9, %v958_v13  ;;  %v973_v16 = vsel %vm972_vm1, %v1315_v52, %v969_v10 }
 0x258   : > { %v978_v19 = vsel %vm975_vm2, %v977_v14, %v973_v16  ;;  %v985_v20 = vrot.slane %v963_v15, 6 }
 0x259   : > { %v986_v21 = vrot.slane %v978_v19, 5 }
 0x25b   : > { %v990_v24 = vsel %vm989_vm3, %v985_v20, %v986_v21 }
 0x25c   : > { %v992_v25 = vsel %vm991_vm5, %v988_v23, %v990_v24 }
 0x25d   : > { %998 = vst.msk [vmem:[%s423_s21] sm:$0xf] %vm996_vm6, %v992_v25 }
 0x25e   : > { %1403 = shalt.err (!%p1400_p7)
}
 0x25f   : > { %1246 = dma.vmem_to_hbm [thread:$0]  (%p1560_p11), %s1013_s11, 64, %s1015_s17, %s1000_s28  }
 0x260 PF: > { %s1811_s0 = sld [smem:[#allocation13_spill]]  ;;  %p1256_p0 = pnand %p1110_p9, %p1564_p12 }
 0x262   : > { %p1257_p8 = pneg %p1256_p0 }
 0x266   : > { %s1026_s22 = sand.u32 1, %s1811_s0  }
 0x267   : > { %s1027_s12 = scalar_lea.sflag [#allocation6], %s1026_s22 }
 0x268   : > { %1429 = dma.done.wait (%p1257_p8), %s1027_s12, 64  }
 0x269   : > { %1431 = vsyncadd (%p1257_p8), %s1027_s12, 4294967232  ;;  %s1813_s18 = sld [smem:[#allocation15_spill]]  ;;  %s1816_s15 = smov %s1438_s16 }
 0x26a   : > { %s1814_s13 = sld [smem:[#allocation14_spill]] }
 0x26b   : > { %s1815_s17 = sld [smem:[#allocation16_spill]] }
 0x26f   : > { %p28_p10 = scmp.ge.s32.totalorder %s1813_s18, 4  }
 0x270   : > { %s1817_s16 = smov %s1814_s13 }
 0x271   :  { %30 = sbr.rel (!%p28_p10) target bundleno = 10 (0xa), region = 118 }
 0x276   :  { %1033 = vsyncpa [#allocation5], 1 }
 0x277   :  { %1035 = vsyncpa [#allocation5 + $0x1], 1 }
 0x278   :  { %1036 = vsyncpa [#allocation8], 1 }
 0x279   :  { %1038 = vsyncpa [#allocation8 + $0x1], 1 }
 0x27a   :  { %1039 = vsyncpa [#allocation6], 1 }
 0x27b   :  { %1041 = vsyncpa [#allocation6 + $0x1], 1 }

</bundles_post_ra>
